<compile_context>
chip_gen: v5e
topology: v5e:2x2
jax: 0.10.0
libtpu: 0.0.40
codegen_flags: <defaults>
</compile_context>

<pallas_src>
import functools

import numpy as np
import jax
import jax.numpy as jnp
from jax.experimental import pallas as pl
from jax.experimental.pallas import tpu as pltpu

WINDOW = 30


def _round_up(x, m):
    return (x + m - 1) // m * m


def eval_criterion_kernel(inp_ref, tar_ref, len_ref, p_ref, out_ref, lhs_ref,
                          *, logit_t):
    b = pl.program_id(0)

    # (4,) SMEM accumulator (TP, TN, FP, FN), resident across the grid.
    @pl.when(b == 0)
    def _init():
        out_ref[0] = 0.0
        out_ref[1] = 0.0
        out_ref[2] = 0.0
        out_ref[3] = 0.0

    tg, sw = inp_ref.shape          # TG groups (sublanes), SW = MAX_S*WINDOW (lanes)
    r_len = p_ref.shape[1]          # MAX_S + WINDOW - 1

    seq_len = len_ref[...]          # (TG, 1) int32; 0 for padded groups
    inp = inp_ref[...]              # (TG, SW) f32
    tar = tar_ref[...]              # (TG, SW) f32
    P = p_ref[...]                  # (SW, R_LEN) 0/1 f32 shear matrix

    # Mask rows l >= seq_len: flattened element j belongs to band row
    # j // WINDOW, so it is valid iff j < seq_len * WINDOW.
    fj = jax.lax.broadcasted_iota(jnp.int32, (tg, sw), 1)
    rmask = (fj < seq_len * WINDOW).astype(jnp.float32)
    inp_m = inp * rmask
    tar_m = tar * rmask

    # One fused MXU matmul for all four (virtual) banded-matrix column
    # reductions: stack [inp sums, inp nonzero, tar sums, tar nonzero].
    lhs_ref[pl.ds(0 * tg, tg), :] = inp_m
    lhs_ref[pl.ds(1 * tg, tg), :] = (inp_m != 0.0).astype(jnp.float32)
    lhs_ref[pl.ds(2 * tg, tg), :] = tar_m
    lhs_ref[pl.ds(3 * tg, tg), :] = (tar_m != 0.0).astype(jnp.float32)
    res = jnp.dot(lhs_ref[...], P, preferred_element_type=jnp.float32)

    isum = res[0 * tg:1 * tg]       # tmp.sum(0) for the input bands
    icnt = res[1 * tg:2 * tg]       # (tmp != 0).float().sum(0) for the inputs
    tsum = res[2 * tg:3 * tg]
    tcnt = res[3 * tg:4 * tg]

    # num[num <= 0] = 1 ; avg = sum * (1 / num)   (exact divide, NOT approx)
    inum = jnp.where(icnt <= 0.0, 1.0, icnt)
    tnum = jnp.where(tcnt <= 0.0, 1.0, tcnt)
    iavg = isum * (1.0 / inum)
    tavg = tsum * (1.0 / tnum)

    # input path: sigmoid(x) > t  <=>  x > logit(t)  ; target path: truncation
    raw_in = (iavg > logit_t).astype(jnp.int32)
    raw_tar = tavg.astype(jnp.int32)

    # Only columns 0 .. seq_len + WINDOW - 2 exist in the torch version;
    # padded groups (seq_len == 0) contribute nothing at all.
    col = jax.lax.broadcasted_iota(jnp.int32, (tg, r_len), 1)
    valid = (col < (seq_len + (WINDOW - 1))) & (seq_len > 0)

    z_in = raw_in == 0
    z_tar = raw_tar == 0

    tp = jnp.sum(jnp.where(valid, raw_in & raw_tar, 0).astype(jnp.float32))
    tn = jnp.sum(jnp.where(valid, (z_in & z_tar).astype(jnp.int32), 0)
                 .astype(jnp.float32))
    fp = jnp.sum(jnp.where(valid, raw_in & z_tar.astype(jnp.int32), 0)
                 .astype(jnp.float32))
    fn = jnp.sum(jnp.where(valid, z_in.astype(jnp.int32) & raw_tar, 0)
                 .astype(jnp.float32))

    out_ref[0] = out_ref[0] + tp
    out_ref[1] = out_ref[1] + tn
    out_ref[2] = out_ref[2] + fp
    out_ref[3] = out_ref[3] + fn


@functools.partial(jax.jit, static_argnames=("t", "block_g"))
def eval_criterion(inputs, targets, lens_index, lens, *, t, block_g=128):
    """Returns jnp.float32[4] = (TP, TN, FP, FN)."""
    assert 0.0 < t < 1.0, "logit-threshold form requires t in (0, 1)"
    G, MAX_S = lens_index.shape
    SW = MAX_S * WINDOW
    R_LEN = MAX_S + WINDOW - 1

    # Groups-per-block: multiple of 8 (sublane packing), capped by padded G.
    TG = _round_up(min(int(block_g), _round_up(G, 8)), 8)
    G_pad = _round_up(G, TG)
    num_blocks = G_pad // TG
    pad = G_pad - G

    # glue: gather per-group rows and flatten them onto the lane axis
    # TODO(synk): for large G*MAX_S, fuse this gather into the kernel via
    # PrefetchScalarGridSpec(lens_index) / manual DMA to halve HBM traffic.
    inp_rows = jnp.take(inputs.astype(jnp.float32), lens_index, axis=0)
    tar_rows = jnp.take(targets.astype(jnp.float32), lens_index, axis=0)
    inp_flat = inp_rows.reshape(G, SW)
    tar_flat = tar_rows.reshape(G, SW)
    lens_col = lens.astype(jnp.int32).reshape(G, 1)

    if pad:
        inp_flat = jnp.pad(inp_flat, ((0, pad), (0, 0)))
        tar_flat = jnp.pad(tar_flat, ((0, pad), (0, 0)))
        lens_col = jnp.pad(lens_col, ((0, pad), (0, 0)))   # seq_len 0 => masked

    # 0/1 shear matrix: flattened element (l, k) lands in band column l + k.
    j = np.arange(SW)
    dst = (j // WINDOW) + (j % WINDOW)
    P = jnp.asarray((np.arange(R_LEN)[None, :] == dst[:, None])
                    .astype(np.float32))

    logit_t = float(np.log(t / (1.0 - t)))

    # Explicit VMEM budget: inp/tar double buffers + single-buffered P +
    # fused-LHS scratch + headroom for temporaries / layout padding.
    vmem_need = 4 * (2 * 2 * TG * SW + SW * R_LEN + 4 * TG * SW
                     + 8 * TG * max(SW, 128) + 4 * TG * 128)
    vmem_limit = int(min(max(2 * vmem_need, 32 * 1024 * 1024),
                         64 * 1024 * 1024))

    kernel = functools.partial(eval_criterion_kernel, logit_t=logit_t)

    counts = pl.pallas_call(
        kernel,
        out_shape=jax.ShapeDtypeStruct((4,), jnp.float32),
        grid=(num_blocks,),
        in_specs=[
            pl.BlockSpec((TG, SW), lambda b: (b, 0)),      # inputs, TG groups
            pl.BlockSpec((TG, SW), lambda b: (b, 0)),      # targets, TG groups
            pl.BlockSpec((TG, 1), lambda b: (b, 0)),       # per-group lengths
            # constant shear matrix: whole array resident in VMEM once
            # (single buffer; a blocked constant index map would double-buffer)
            pl.BlockSpec(memory_space=pltpu.MemorySpace.VMEM),
        ],
        out_specs=pl.BlockSpec(memory_space=pltpu.MemorySpace.SMEM),
        scratch_shapes=[pltpu.VMEM((4 * TG, SW), jnp.float32)],
        compiler_params=pltpu.CompilerParams(
            # TODO(synk): on v7x, emit per-block (num_blocks, 4) partials and
            # mark this axis "parallel" to shard groups across both TensorCores.
            dimension_semantics=("arbitrary",),
            vmem_limit_bytes=vmem_limit,
        ),
    )(inp_flat, tar_flat, lens_col, P)
    return counts


# ---------- pure-numpy reference mirroring the PyTorch module ----------
def _ref_get_raw(mat, idxs, t, to_label):
    r_sub = len(idxs)
    r_len = r_sub + WINDOW - 1
    tmp = np.zeros((r_sub, r_len), dtype=np.float32)
    for l in range(r_sub):
        tmp[l, l:l + WINDOW] = mat[idxs[l]]
    num = (tmp != 0).astype(np.float32).sum(0)
    num[num <= 0] = 1
    v = (tmp.sum(0) * (np.float32(1.0) / num)).astype(np.float32)
    if to_label:
        v = np.float32(1.0) / (np.float32(1.0) + np.exp(-v))
        v = (v > t).astype(np.float32)
    return v.astype(np.int64)


def _ref_forward(inputs, targets, lens_index, lens, t):
    TP = TN = FP = FN = 0.0
    for g in range(len(lens)):
        idxs = list(lens_index[g][: lens[g]])
        ri = _ref_get_raw(inputs, idxs, t, True)
        rt = _ref_get_raw(targets, idxs, t, False)
        TP += float(np.sum(ri & rt))
        TN += float(np.sum((ri == 0) & (rt == 0)))
        FP += float(np.sum(ri & (rt == 0).astype(np.int64)))
        FN += float(np.sum((ri == 0).astype(np.int64) & rt))
    return np.array([TP, TN, FP, FN], dtype=np.float32)


if __name__ == "__main__":
    key = jax.random.PRNGKey(0)
    k1, k2 = jax.random.split(key)

    N = 12          # total number of length-30 prediction rows
    G = 2           # number of sequences (groups)
    MAX_S = 8       # padded per-group length

    # small-integer inputs (zeros included -> exercises the nonzero-count path)
    inputs = jax.random.randint(k1, (N, WINDOW), -2, 3).astype(jnp.float32)
    targets = jax.random.bernoulli(k2, 0.4, (N, WINDOW)).astype(jnp.float32)

    lens = jnp.array([8, 5], dtype=jnp.int32)
    lens_index = jnp.array(
        [[0, 1, 2, 3, 4, 5, 6, 7],
         [8, 9, 10, 11, 3, 0, 0, 0]], dtype=jnp.int32)   # padded past lens[g]

    t = 0.5

    counts = eval_criterion(inputs, targets, lens_index, lens, t=t, block_g=128)
    counts = jax.block_until_ready(counts)

    ref = _ref_forward(np.asarray(inputs), np.asarray(targets),
                       np.asarray(lens_index), np.asarray(lens), t)
    assert np.array_equal(np.asarray(counts), ref), (np.asarray(counts), ref)
    print("KERNEL_OK")
</pallas_src>

<mosaic_0001>
module attributes {stable_mosaic.version = 11 : i64} {
  func.func @eval_criterion_kernel(%arg0: i32, %arg1: memref<8x240xf32, #tpu.memory_space<vmem>>, %arg2: memref<8x240xf32, #tpu.memory_space<vmem>>, %arg3: memref<8x1xi32, #tpu.memory_space<vmem>>, %arg4: memref<240x37xf32, #tpu.memory_space<vmem>>, %arg5: memref<4xf32, #tpu.memory_space<smem>>, %arg6: memref<32x240xf32, #tpu.memory_space<vmem>>) attributes {dimension_semantics = [#tpu.dimension_semantics<arbitrary>], iteration_bounds = array<i64: 1>, scalar_prefetch = 0 : i64, scratch_operands = 1 : i64, tpu.core_type = #tpu.core_type<tc>, window_params = [{transform_indices = @transform_0, window_bounds = array<i64: 8, 240>}, {transform_indices = @transform_1, window_bounds = array<i64: 8, 240>}, {transform_indices = @transform_2, window_bounds = array<i64: 8, 1>}, {pipeline_mode = #tpu.pipeline_mode<synchronous>, transform_indices = @transform_3, window_bounds = array<i64: 240, 37>}, {transform_indices = @transform_4, window_bounds = array<i64: 4>}]} {
    %c0_i32 = arith.constant 0 : i32
    %0 = arith.cmpi eq, %arg0, %c0_i32 : i32
    %1 = arith.extui %0 : i1 to i32
    %c0_i32_0 = arith.constant 0 : i32
    %2 = arith.cmpi ne, %1, %c0_i32_0 : i32
    scf.if %2 {
      %cst_40 = arith.constant 0.000000e+00 : f32
      %c0_41 = arith.constant 0 : index
      %112 = memref.load %arg5[%c0_41] : memref<4xf32, #tpu.memory_space<smem>>
      memref.store %cst_40, %arg5[%c0_41] : memref<4xf32, #tpu.memory_space<smem>>
      %cst_42 = arith.constant 0.000000e+00 : f32
      %c1_43 = arith.constant 1 : index
      %113 = memref.load %arg5[%c1_43] : memref<4xf32, #tpu.memory_space<smem>>
      memref.store %cst_42, %arg5[%c1_43] : memref<4xf32, #tpu.memory_space<smem>>
      %cst_44 = arith.constant 0.000000e+00 : f32
      %c2_45 = arith.constant 2 : index
      %114 = memref.load %arg5[%c2_45] : memref<4xf32, #tpu.memory_space<smem>>
      memref.store %cst_44, %arg5[%c2_45] : memref<4xf32, #tpu.memory_space<smem>>
      %cst_46 = arith.constant 0.000000e+00 : f32
      %c3_47 = arith.constant 3 : index
      %115 = memref.load %arg5[%c3_47] : memref<4xf32, #tpu.memory_space<smem>>
      memref.store %cst_46, %arg5[%c3_47] : memref<4xf32, #tpu.memory_space<smem>>
    } else {
    }
    %c0 = arith.constant 0 : index
    %c0_1 = arith.constant 0 : index
    %3 = vector.load %arg3[%c0, %c0_1] : memref<8x1xi32, #tpu.memory_space<vmem>>, vector<8x1xi32>
    %c0_2 = arith.constant 0 : index
    %c0_3 = arith.constant 0 : index
    %4 = vector.load %arg1[%c0_2, %c0_3] : memref<8x240xf32, #tpu.memory_space<vmem>>, vector<8x240xf32>
    %c0_4 = arith.constant 0 : index
    %c0_5 = arith.constant 0 : index
    %5 = vector.load %arg2[%c0_4, %c0_5] : memref<8x240xf32, #tpu.memory_space<vmem>>, vector<8x240xf32>
    %c0_6 = arith.constant 0 : index
    %c0_7 = arith.constant 0 : index
    %6 = vector.load %arg4[%c0_6, %c0_7] : memref<240x37xf32, #tpu.memory_space<vmem>>, vector<240x37xf32>
    %7 = tpu.iota {dimensions = array<i32: 1>} : vector<8x240xi32>
    %c30_i32 = arith.constant 30 : i32
    %8 = vector.broadcast %c30_i32 : i32 to vector<8x1xi32>
    %9 = arith.muli %3, %8 : vector<8x1xi32>
    %10 = vector.broadcast %9 : vector<8x1xi32> to vector<8x240xi32>
    %11 = arith.cmpi slt, %7, %10 : vector<8x240xi32>
    %12 = arith.extui %11 : vector<8x240xi1> to vector<8x240xi32>
    %13 = arith.sitofp %12 : vector<8x240xi32> to vector<8x240xf32>
    %14 = arith.mulf %4, %13 : vector<8x240xf32>
    %15 = arith.mulf %5, %13 : vector<8x240xf32>
    %c0_8 = arith.constant 0 : index
    %c0_9 = arith.constant 0 : index
    %16 = vector.load %arg6[%c0_8, %c0_9] : memref<32x240xf32, #tpu.memory_space<vmem>>, vector<8x240xf32>
    tpu.vector_store %arg6[%c0_8, %c0_9], %14 {strides = array<i32>} : memref<32x240xf32, #tpu.memory_space<vmem>>, vector<8x240xf32>,
    %cst = arith.constant 0.000000e+00 : f32
    %17 = vector.broadcast %cst : f32 to vector<8x240xf32>
    %18 = arith.cmpf one, %14, %17 : vector<8x240xf32>
    %19 = arith.extui %18 : vector<8x240xi1> to vector<8x240xi32>
    %20 = arith.sitofp %19 : vector<8x240xi32> to vector<8x240xf32>
    %c8 = arith.constant 8 : index
    %c0_10 = arith.constant 0 : index
    %21 = vector.load %arg6[%c8, %c0_10] : memref<32x240xf32, #tpu.memory_space<vmem>>, vector<8x240xf32>
    tpu.vector_store %arg6[%c8, %c0_10], %20 {strides = array<i32>} : memref<32x240xf32, #tpu.memory_space<vmem>>, vector<8x240xf32>,
    %c16 = arith.constant 16 : index
    %c0_11 = arith.constant 0 : index
    %22 = vector.load %arg6[%c16, %c0_11] : memref<32x240xf32, #tpu.memory_space<vmem>>, vector<8x240xf32>
    tpu.vector_store %arg6[%c16, %c0_11], %15 {strides = array<i32>} : memref<32x240xf32, #tpu.memory_space<vmem>>, vector<8x240xf32>,
    %cst_12 = arith.constant 0.000000e+00 : f32
    %23 = vector.broadcast %cst_12 : f32 to vector<8x240xf32>
    %24 = arith.cmpf one, %15, %23 : vector<8x240xf32>
    %25 = arith.extui %24 : vector<8x240xi1> to vector<8x240xi32>
    %26 = arith.sitofp %25 : vector<8x240xi32> to vector<8x240xf32>
    %c24 = arith.constant 24 : index
    %c0_13 = arith.constant 0 : index
    %27 = vector.load %arg6[%c24, %c0_13] : memref<32x240xf32, #tpu.memory_space<vmem>>, vector<8x240xf32>
    tpu.vector_store %arg6[%c24, %c0_13], %26 {strides = array<i32>} : memref<32x240xf32, #tpu.memory_space<vmem>>, vector<8x240xf32>,
    %c0_14 = arith.constant 0 : index
    %c0_15 = arith.constant 0 : index
    %28 = vector.load %arg6[%c0_14, %c0_15] : memref<32x240xf32, #tpu.memory_space<vmem>>, vector<32x240xf32>
    %cst_16 = arith.constant dense<0.000000e+00> : vector<32x37xf32>
    %29 = tpu.matmul %28, %6, %cst_16 {dimension_numbers = #tpu.dot_dimension_numbers<[1], [0], [0], [1], [0, 0, 1, 1], [], []>} : vector<32x240xf32>, vector<240x37xf32>, vector<32x37xf32> -> vector<32x37xf32>
    %30 = vector.extract_strided_slice %29 {offsets = [0, 0], sizes = [8, 37], strides = [1, 1]} : vector<32x37xf32> to vector<8x37xf32>
    %31 = vector.extract_strided_slice %29 {offsets = [8, 0], sizes = [8, 37], strides = [1, 1]} : vector<32x37xf32> to vector<8x37xf32>
    %32 = vector.extract_strided_slice %29 {offsets = [16, 0], sizes = [8, 37], strides = [1, 1]} : vector<32x37xf32> to vector<8x37xf32>
    %33 = vector.extract_strided_slice %29 {offsets = [24, 0], sizes = [8, 37], strides = [1, 1]} : vector<32x37xf32> to vector<8x37xf32>
    %cst_17 = arith.constant 0.000000e+00 : f32
    %34 = vector.broadcast %cst_17 : f32 to vector<8x37xf32>
    %35 = arith.cmpf ole, %31, %34 : vector<8x37xf32>
    %cst_18 = arith.constant 1.000000e+00 : f32
    %36 = vector.broadcast %cst_18 : f32 to vector<8x37xf32>
    %37 = arith.select %35, %36, %31 : vector<8x37xi1>, vector<8x37xf32>
    %cst_19 = arith.constant 0.000000e+00 : f32
    %38 = vector.broadcast %cst_19 : f32 to vector<8x37xf32>
    %39 = arith.cmpf ole, %33, %38 : vector<8x37xf32>
    %cst_20 = arith.constant 1.000000e+00 : f32
    %40 = vector.broadcast %cst_20 : f32 to vector<8x37xf32>
    %41 = arith.select %39, %40, %33 : vector<8x37xi1>, vector<8x37xf32>
    %cst_21 = arith.constant 1.000000e+00 : f32
    %42 = vector.broadcast %cst_21 : f32 to vector<8x37xf32>
    %43 = arith.divf %42, %37 : vector<8x37xf32>
    %44 = arith.mulf %30, %43 : vector<8x37xf32>
    %cst_22 = arith.constant 1.000000e+00 : f32
    %45 = vector.broadcast %cst_22 : f32 to vector<8x37xf32>
    %46 = arith.divf %45, %41 : vector<8x37xf32>
    %47 = arith.mulf %32, %46 : vector<8x37xf32>
    %cst_23 = arith.constant 0.000000e+00 : f32
    %48 = vector.broadcast %cst_23 : f32 to vector<8x37xf32>
    %49 = arith.cmpf ogt, %44, %48 : vector<8x37xf32>
    %50 = arith.extui %49 : vector<8x37xi1> to vector<8x37xi32>
    %51 = arith.fptosi %47 : vector<8x37xf32> to vector<8x37xi32>
    %52 = tpu.iota {dimensions = array<i32: 1>} : vector<8x37xi32>
    %c29_i32 = arith.constant 29 : i32
    %53 = vector.broadcast %c29_i32 : i32 to vector<8x1xi32>
    %54 = arith.addi %3, %53 : vector<8x1xi32>
    %55 = vector.broadcast %54 : vector<8x1xi32> to vector<8x37xi32>
    %56 = arith.cmpi slt, %52, %55 : vector<8x37xi32>
    %c0_i32_24 = arith.constant 0 : i32
    %57 = vector.broadcast %c0_i32_24 : i32 to vector<8x1xi32>
    %58 = arith.cmpi sgt, %3, %57 : vector<8x1xi32>
    %59 = vector.broadcast %58 : vector<8x1xi1> to vector<8x37xi1>
    %60 = arith.andi %56, %59 : vector<8x37xi1>
    %c0_i32_25 = arith.constant 0 : i32
    %61 = vector.broadcast %c0_i32_25 : i32 to vector<8x37xi32>
    %62 = arith.cmpi eq, %50, %61 : vector<8x37xi32>
    %c0_i32_26 = arith.constant 0 : i32
    %63 = vector.broadcast %c0_i32_26 : i32 to vector<8x37xi32>
    %64 = arith.cmpi eq, %51, %63 : vector<8x37xi32>
    %65 = arith.andi %50, %51 : vector<8x37xi32>
    %c0_i32_27 = arith.constant 0 : i32
    %66 = vector.broadcast %c0_i32_27 : i32 to vector<8x37xi32>
    %67 = arith.select %60, %65, %66 : vector<8x37xi1>, vector<8x37xi32>
    %68 = arith.sitofp %67 : vector<8x37xi32> to vector<8x37xf32>
    %69 = vector.shape_cast %68 : vector<8x37xf32> to vector<1x8x37xf32>
    %cst_28 = arith.constant dense<0.000000e+00> : vector<1xf32>
    %70 = vector.multi_reduction <add>, %69, %cst_28 [1, 2] : vector<1x8x37xf32> to vector<1xf32>
    %71 = vector.shape_cast %70 : vector<1xf32> to vector<1x1x1xf32>
    %72 = vector.extract %71[0, 0, 0] : f32 from vector<1x1x1xf32>
    %73 = arith.andi %62, %64 : vector<8x37xi1>
    %74 = arith.extui %73 : vector<8x37xi1> to vector<8x37xi32>
    %c0_i32_29 = arith.constant 0 : i32
    %75 = vector.broadcast %c0_i32_29 : i32 to vector<8x37xi32>
    %76 = arith.select %60, %74, %75 : vector<8x37xi1>, vector<8x37xi32>
    %77 = arith.sitofp %76 : vector<8x37xi32> to vector<8x37xf32>
    %78 = vector.shape_cast %77 : vector<8x37xf32> to vector<1x8x37xf32>
    %cst_30 = arith.constant dense<0.000000e+00> : vector<1xf32>
    %79 = vector.multi_reduction <add>, %78, %cst_30 [1, 2] : vector<1x8x37xf32> to vector<1xf32>
    %80 = vector.shape_cast %79 : vector<1xf32> to vector<1x1x1xf32>
    %81 = vector.extract %80[0, 0, 0] : f32 from vector<1x1x1xf32>
    %82 = arith.extui %64 : vector<8x37xi1> to vector<8x37xi32>
    %83 = arith.andi %50, %82 : vector<8x37xi32>
    %c0_i32_31 = arith.constant 0 : i32
    %84 = vector.broadcast %c0_i32_31 : i32 to vector<8x37xi32>
    %85 = arith.select %60, %83, %84 : vector<8x37xi1>, vector<8x37xi32>
    %86 = arith.sitofp %85 : vector<8x37xi32> to vector<8x37xf32>
    %87 = vector.shape_cast %86 : vector<8x37xf32> to vector<1x8x37xf32>
    %cst_32 = arith.constant dense<0.000000e+00> : vector<1xf32>
    %88 = vector.multi_reduction <add>, %87, %cst_32 [1, 2] : vector<1x8x37xf32> to vector<1xf32>
    %89 = vector.shape_cast %88 : vector<1xf32> to vector<1x1x1xf32>
    %90 = vector.extract %89[0, 0, 0] : f32 from vector<1x1x1xf32>
    %91 = arith.extui %62 : vector<8x37xi1> to vector<8x37xi32>
    %92 = arith.andi %91, %51 : vector<8x37xi32>
    %c0_i32_33 = arith.constant 0 : i32
    %93 = vector.broadcast %c0_i32_33 : i32 to vector<8x37xi32>
    %94 = arith.select %60, %92, %93 : vector<8x37xi1>, vector<8x37xi32>
    %95 = arith.sitofp %94 : vector<8x37xi32> to vector<8x37xf32>
    %96 = vector.shape_cast %95 : vector<8x37xf32> to vector<1x8x37xf32>
    %cst_34 = arith.constant dense<0.000000e+00> : vector<1xf32>
    %97 = vector.multi_reduction <add>, %96, %cst_34 [1, 2] : vector<1x8x37xf32> to vector<1xf32>
    %98 = vector.shape_cast %97 : vector<1xf32> to vector<1x1x1xf32>
    %99 = vector.extract %98[0, 0, 0] : f32 from vector<1x1x1xf32>
    %c0_35 = arith.constant 0 : index
    %100 = memref.load %arg5[%c0_35] : memref<4xf32, #tpu.memory_space<smem>>
    %101 = arith.addf %100, %72 : f32
    %c0_36 = arith.constant 0 : index
    %102 = memref.load %arg5[%c0_36] : memref<4xf32, #tpu.memory_space<smem>>
    memref.store %101, %arg5[%c0_36] : memref<4xf32, #tpu.memory_space<smem>>
    %c1 = arith.constant 1 : index
    %103 = memref.load %arg5[%c1] : memref<4xf32, #tpu.memory_space<smem>>
    %104 = arith.addf %103, %81 : f32
    %c1_37 = arith.constant 1 : index
    %105 = memref.load %arg5[%c1_37] : memref<4xf32, #tpu.memory_space<smem>>
    memref.store %104, %arg5[%c1_37] : memref<4xf32, #tpu.memory_space<smem>>
    %c2 = arith.constant 2 : index
    %106 = memref.load %arg5[%c2] : memref<4xf32, #tpu.memory_space<smem>>
    %107 = arith.addf %106, %90 : f32
    %c2_38 = arith.constant 2 : index
    %108 = memref.load %arg5[%c2_38] : memref<4xf32, #tpu.memory_space<smem>>
    memref.store %107, %arg5[%c2_38] : memref<4xf32, #tpu.memory_space<smem>>
    %c3 = arith.constant 3 : index
    %109 = memref.load %arg5[%c3] : memref<4xf32, #tpu.memory_space<smem>>
    %110 = arith.addf %109, %99 : f32
    %c3_39 = arith.constant 3 : index
    %111 = memref.load %arg5[%c3_39] : memref<4xf32, #tpu.memory_space<smem>>
    memref.store %110, %arg5[%c3_39] : memref<4xf32, #tpu.memory_space<smem>>
    return
  }
  func.func @transform_0(%arg0: i32) -> (i32, i32) {
    %c0_i32 = arith.constant 0 : i32
    %c0_i32_0 = arith.constant 0 : i32
    return %arg0, %c0_i32 : i32, i32
  }
  func.func @transform_1(%arg0: i32) -> (i32, i32) {
    %c0_i32 = arith.constant 0 : i32
    %c0_i32_0 = arith.constant 0 : i32
    return %arg0, %c0_i32 : i32, i32
  }
  func.func @transform_2(%arg0: i32) -> (i32, i32) {
    %c0_i32 = arith.constant 0 : i32
    %c0_i32_0 = arith.constant 0 : i32
    return %arg0, %c0_i32 : i32, i32
  }
  func.func @transform_3(%arg0: i32) -> (i32, i32) {
    %c0_i32 = arith.constant 0 : i32
    %c0_i32_0 = arith.constant 0 : i32
    %c0_i32_1 = arith.constant 0 : i32
    return %c0_i32, %c0_i32_0 : i32, i32
  }
  func.func @transform_4(%arg0: i32) -> i32 {
    %c0_i32 = arith.constant 0 : i32
    %c0_i32_0 = arith.constant 0 : i32
    return %c0_i32 : i32
  }
}

</mosaic_0001>

<bundles_post_ra>
// kernel: eval_criterion.1
= control target key start
LH: loop header
LB: loop body
LE: loop exit
PB: predicated region body
PF: predicated region fallthrough
CT: control target
= control target key end

     0   :  { %v414_v2 = vmov 0   ;;  %s595_s0 = inlined_call_operand.vmem [shape: f32[8,240], index: 0, kind: input, shape index: {}]   ;;  %s596_s1 = inlined_call_operand.vmem [shape: f32[8,240], index: 1, kind: input, shape index: {}]   ;;  %s597_s2 = inlined_call_operand.vmem [shape: s32[8,1], index: 2, kind: input, shape index: {}]   ;;  %s598_s3 = inlined_call_operand.vmem [shape: f32[240,37], index: 3, kind: input, shape index: {}]   ;;  %s599_s4 = inlined_call_operand.hbm [shape: f32[4], index: 4, kind: output, shape index: {}]  }
   0x1   :  { %v30_v0 = vld [vmem:[%s597_s2] sm:$0xff]  ;;  %v50_v1 = vld [vmem:[%s598_s3 + $0x78] sm:$0xff]  ;;  %392 = vset.pattern.permute.xlu0 %v414_v2  ;;  %393 = vset.pattern.permute.xlu1 %v414_v2  ;;  %v49_v4 = vld [vmem:[%s598_s3 + $0x70] sm:$0xff] }
   0x2   :  { %v68_v3 = vmul.u32 30, %v30_v0  ;;  %vm225_vm0 = vcmp.gt.s32.totalorder %v30_v0, 0  ;;  %123 = vmatpush.msra.mxu0 %v50_v1  ;;  %345 = vmatpush.msra.mxu2 %v50_v1  ;;  %v64_v6 = vld [vmem:[%s598_s3 + $0xe8] sm:$0xff]  ;;  %v63_v8 = vld [vmem:[%s598_s3 + $0xe0] sm:$0xff]  ;;  %v62_v10 = vld [vmem:[%s598_s3 + $0xd8] sm:$0xff]  ;;  %v220_v11 = vadd.s32 29, %v30_v0 }
   0x3   :  { %v226_v5 = vsel %vm225_vm0, 1, %v414_v2  ;;  %v48_v7 = vld [vmem:[%s598_s3 + $0x68] sm:$0xff]  ;;  %154 = vmatpush.msra.mxu1 %v64_v6  ;;  %v47_v9 = vld [vmem:[%s598_s3 + $0x60] sm:$0xff]  ;;  %361 = vmatpush.msra.mxu3 %v64_v6  ;;  %v46_v12 = vld [vmem:[%s598_s3 + $0x58] sm:$0xff] }
   0x4   :  { %70 = vperm.xlu0 %392, %v68_v3   ;;  %228 = vperm.xlu1 %393, %v226_v5  }
   0x5   :  { %124 = vmatpush.msra.mxu0 %v49_v4  ;;  %346 = vmatpush.msra.mxu2 %v49_v4 }
   0x6   :  { %155 = vmatpush.msra.mxu1 %v63_v8  ;;  %362 = vmatpush.msra.mxu3 %v63_v8 }
   0x7   :  { %125 = vmatpush.msra.mxu0 %v48_v7  ;;  %347 = vmatpush.msra.mxu2 %v48_v7 }
   0x8   :  { %9 = vsyncpa [#allocation4], 0  ;;  %v61_v13 = vld [vmem:[%s598_s3 + $0xd0] sm:$0xff]  ;;  %156 = vmatpush.msra.mxu1 %v62_v10  ;;  %363 = vmatpush.msra.mxu3 %v62_v10  ;;  %v60_v15 = vld [vmem:[%s598_s3 + $0xc8] sm:$0xff]  ;;  %v65_v35 = vlaneseq  ;;  %vm83_vm3 = vcmask 916480   ;;  %v415_v43 = vmov 0.0  }
   0x9   :  { %126 = vmatpush.msra.mxu0 %v47_v9  ;;  %348 = vmatpush.msra.mxu2 %v47_v9  ;;  %v45_v14 = vld [vmem:[%s598_s3 + $0x50] sm:$0xff]  ;;  %v44_v16 = vld [vmem:[%s598_s3 + $0x48] sm:$0xff]  ;;  %v59_v17 = vld [vmem:[%s598_s3 + $0xc0] sm:$0xff]  ;;  %v416_v51 = vmov 1.0   ;;  %s311_s5 = sshll.u32 %s599_s4, 4  ;;  %s417_s8 = smov [#allocation3]   ;;  %s312_s5 = int_to_ptr.hbm [resolvable:$true] %s311_s5 }
   0xa   :  { %157 = vmatpush.msra.mxu1 %v61_v13  ;;  %364 = vmatpush.msra.mxu3 %v61_v13  ;;  %v43_v18 = vld [vmem:[%s598_s3 + $0x40] sm:$0xff]  ;;  %v58_v19 = vld [vmem:[%s598_s3 + $0xb8] sm:$0xff]  ;;  %v57_v21 = vld [vmem:[%s598_s3 + $0xb0] sm:$0xff]  ;;  %v539_v36 = vand.u32 127, %v65_v35 }
   0xb   :  { %127 = vmatpush.msra.mxu0 %v46_v12  ;;  %349 = vmatpush.msra.mxu2 %v46_v12  ;;  %v42_v20 = vld [vmem:[%s598_s3 + $0x38] sm:$0xff]  ;;  %v41_v22 = vld [vmem:[%s598_s3 + $0x30] sm:$0xff]  ;;  %v40_v23 = vld [vmem:[%s598_s3 + $0x28] sm:$0xff] }
   0xc   :  { %222 = vperm.xlu0 %392, %v220_v11   ;;  %158 = vmatpush.msra.mxu1 %v60_v15  ;;  %v39_v24 = vld [vmem:[%s598_s3 + $0x20] sm:$0xff]  ;;  %v38_v25 = vld [vmem:[%s598_s3 + $0x18] sm:$0xff]  ;;  %v37_v26 = vld [vmem:[%s598_s3 + $0x10] sm:$0xff]  ;;  %v67_v37 = vadd.s32 128, %v539_v36 }
   0xd   :  { %128 = vmatpush.msra.mxu0 %v45_v14  ;;  %350 = vmatpush.msra.mxu2 %v45_v14  ;;  %v56_v27 = vld [vmem:[%s598_s3 + $0xa8] sm:$0xff]  ;;  %v55_v29 = vld [vmem:[%s598_s3 + $0xa0] sm:$0xff]  ;;  %v54_v31 = vld [vmem:[%s598_s3 + $0x98] sm:$0xff] }
   0xe   :  { %365 = vmatpush.msra.mxu3 %v60_v15  ;;  %159 = vmatpush.msra.mxu1 %v59_v17  ;;  %v36_v28 = vld [vmem:[%s598_s3 + $0x8] sm:$0xff]  ;;  %v35_v30 = vld [vmem:[%s598_s3] sm:$0xff]  ;;  %v53_v32 = vld [vmem:[%s598_s3 + $0x90] sm:$0xff] }
   0xf   :  { %129 = vmatpush.msra.mxu0 %v44_v16  ;;  %351 = vmatpush.msra.mxu2 %v44_v16  ;;  %v52_v33 = vld [vmem:[%s598_s3 + $0x88] sm:$0xff]  ;;  %v51_v34 = vld [vmem:[%s598_s3 + $0x80] sm:$0xff] }
  0x10   :  { %366 = vmatpush.msra.mxu3 %v59_v17  ;;  %160 = vmatpush.msra.mxu1 %v58_v19  ;;  %v31_v38 = vld [vmem:[%s595_s0] sm:$0xff]  ;;  %v32_v39 = vld [vmem:[%s595_s0 + $0x8] sm:$0xff] }
  0x11   :  { %130 = vmatpush.msra.mxu0 %v43_v18  ;;  %352 = vmatpush.msra.mxu2 %v43_v18  ;;  %v33_v40 = vld [vmem:[%s596_s1] sm:$0xff]  ;;  %v34_v41 = vld [vmem:[%s596_s1 + $0x8] sm:$0xff] }
  0x12   :  { %367 = vmatpush.msra.mxu3 %v58_v19  ;;  %161 = vmatpush.msra.mxu1 %v57_v21 }
  0x13   :  { %131 = vmatpush.msra.mxu0 %v42_v20  ;;  %353 = vmatpush.msra.mxu2 %v42_v20 }
  0x14   :  { %368 = vmatpush.msra.mxu3 %v57_v21  ;;  %162 = vmatpush.msra.mxu1 %v56_v27 }
  0x15   :  { %132 = vmatpush.msra.mxu0 %v41_v22  ;;  %354 = vmatpush.msra.mxu2 %v41_v22 }
  0x16   :  { %369 = vmatpush.msra.mxu3 %v56_v27  ;;  %163 = vmatpush.msra.mxu1 %v55_v29 }
  0x17   :  { %133 = vmatpush.msra.mxu0 %v40_v23  ;;  %355 = vmatpush.msra.mxu2 %v40_v23 }
  0x18   :  { %370 = vmatpush.msra.mxu3 %v55_v29  ;;  %164 = vmatpush.msra.mxu1 %v54_v31 }
  0x19   :  { %134 = vmatpush.msra.mxu0 %v39_v24  ;;  %356 = vmatpush.msra.mxu2 %v39_v24 }
  0x1a   :  { %371 = vmatpush.msra.mxu3 %v54_v31  ;;  %165 = vmatpush.msra.mxu1 %v53_v32 }
  0x1b   :  { %135 = vmatpush.msra.mxu0 %v38_v25  ;;  %357 = vmatpush.msra.mxu2 %v38_v25 }
  0x1c   :  { %372 = vmatpush.msra.mxu3 %v53_v32  ;;  %166 = vmatpush.msra.mxu1 %v52_v33 }
  0x1d   :  { %136 = vmatpush.msra.mxu0 %v37_v26  ;;  %358 = vmatpush.msra.mxu2 %v37_v26 }
  0x1e   :  { %373 = vmatpush.msra.mxu3 %v52_v33  ;;  %167 = vmatpush.msra.mxu1 %v51_v34 }
  0x1f   :  { %137 = vmatpush.msra.mxu0 %v36_v28  ;;  %359 = vmatpush.msra.mxu2 %v36_v28 }
  0x20   :  { %374 = vmatpush.msra.mxu3 %v51_v34 }
  0x21   :  { %138 = vmatpush.msra.mxu0 %v35_v30  ;;  %360 = vmatpush.msra.mxu2 %v35_v30 }
  0x76   :  { %v71_v42 = vpop.permute.xlu0 %70  ;;  %v229_v32 = vpop.permute.xlu1 %228 }
  0x77   :  { %vm72_vm1 = vcmp.lt.s32.totalorder %v539_v36, %v71_v42  ;;  %vm73_vm2 = vcmp.lt.s32.totalorder %v67_v37, %v71_v42 }
  0x78   :  { %v321_v44 = vsel %vm72_vm1, 1.0, %v415_v43  ;;  %v322_v45 = vsel %vm73_vm2, 1.0, %v415_v43 }
  0x79   :  { %v78_v46 = vmul.f32 %v321_v44, %v31_v38  ;;  %v79_v47 = vmul.f32 %v322_v45, %v32_v39  ;;  %v80_v48 = vmul.f32 %v321_v44, %v33_v40  ;;  %v81_v49 = vmul.f32 %v322_v45, %v34_v41 }
  0x7b   :  { %vm85_vm4 = vcmp.ne.f32.partialorder %v78_v46, 0.0  ;;  %vm86_vm5 = vcmp.ne.f32.partialorder %v79_v47, 0.0  ;;  %vm95_vm6 = vcmp.ne.f32.partialorder %v80_v48, 0.0  ;;  %139 = vmatmul.f32.vlgmr.msra.gmra.mxu0 %v78_v46  ;;  %84 = vst.msk [vmem:[#allocation2 + $0x8] sm:$0xff] %vm83_vm3, %v79_v47  ;;  %vm96_vm7 = vcmp.ne.f32.partialorder %v81_v49, 0.0 }
  0x7c   :  { %v324_v50 = vsel %vm86_vm5, 1.0, %v415_v43  ;;  %398 = vmatmul.msk.f32.vlgmr.msra.gmra.mxu2 %vm85_vm4, %v416_v51  ;;  %v326_v52 = vsel %vm96_vm7, 1.0, %v415_v43  ;;  %94 = vst.msk [vmem:[#allocation2 + $0x28] sm:$0xff] %vm83_vm3, %v81_v49  ;;  %vm230_vm5 = vcmp.eq.s32.totalorder %v229_v32, 1 }
  0x7d   :  { %92 = vst.msk [vmem:[#allocation2 + $0x18] sm:$0xff] %vm83_vm3, %v324_v50 }
  0x7e   :  { %102 = vst.msk [vmem:[#allocation2 + $0x38] sm:$0xff] %vm83_vm3, %v326_v52  ;;  %v223_v33 = vpop.permute.xlu0 %222 }
  0x82   :  { %v104_v53 = vld [vmem:[#allocation2 + $0x8] sm:$0xff] }
  0x83   :  { %327 = vmatmul.msk.f32.vlgmr.msra.gmra.mxu1 %vm83_vm3, %v104_v53  ;;  %v108_v55 = vld [vmem:[#allocation2 + $0x28] sm:$0xff] }
  0x84   :  { %v106_v54 = vld [vmem:[#allocation2 + $0x18] sm:$0xff]  ;;  %145 = vmatmul.f32.gmra.mxu2 %v80_v48 }
  0x85   :  { %328 = vmatmul.msk.f32.vlgmr.msra.gmra.mxu3 %vm83_vm3, %v106_v54  ;;  %v110_v56 = vld [vmem:[#allocation2 + $0x38] sm:$0xff] }
  0x8c   :  { %399 = vmatmul.msk.f32.gmra.mxu2 %vm95_vm6, %v416_v51  ;;  %vm224_vm6 = vcmp.lt.s32.totalorder %v539_v36, %v223_v33 }
  0x8d   :  { %329 = vmatmul.msk.f32.gmra.mxu3 %vm83_vm3, %v108_v55 }
  0x95   :  { %330 = vmatmul.msk.f32.gmra.mxu3 %vm83_vm3, %v110_v56 }
  0xf8   :  { %v140_v17 = vpop.f32.mrf.mxu0 }
  0xff   :  { %v143_v57 = vpop.f32.mrf.mxu2 }
 0x100   :  { %v169_v14 = vpop.f32.mrf.mxu1 }
 0x101   :  { %v170_v20 = vadd.f32 %v169_v14, %v140_v17 }
 0x107   :  { %v146_v61 = vpop.f32.mrf.mxu2 }
 0x108   :  { %v172_v58 = vpop.f32.mrf.mxu3 }
 0x109   :  { %v173_v59 = vadd.f32 %v172_v58, %v143_v57 }
 0x10b   :  { %vm181_vm8 = vcmp.le.f32.partialorder %v173_v59, 0.0 }
 0x10c   :  { %v182_v60 = vsel %vm181_vm8, 1.0, %v173_v59  ;;  %vm237_vm8 = vcmask 302080  }
 0x10d   :  { %394 = vrcp.f32 %v182_v60  ;;  %v196_v9 = vand.u32 2147483648, %v182_v60  ;;  %vm190_vm11 = vweird.f32 %v182_v60  ;;  %v194_v10 = vand.u32 2147483647, %v182_v60 }
 0x10f   :  { %v149_v3 = vpop.f32.mrf.mxu2  ;;  %v197_v15 = vor.u32 1.1754944e-38, %v196_v9  ;;  %vm195_vm13 = vcmp.eq.f32.partialorder %v194_v10, 8.507059e+37 }
 0x110   :  { %v175_v62 = vpop.f32.mrf.mxu3 }
 0x111   :  { %v176_v26 = vadd.f32 %v175_v62, %v146_v61 }
 0x113   :  { %v395_v63 = vpop.eup %394 }
 0x114   :  { %v186_v0 = vmul.f32 %v395_v63, %v182_v60  ;;  %vm191_vm10 = vweird.f32 %v395_v63 }
 0x115   :  { %vm192_vm12 = vmor %vm190_vm11, %vm191_vm10 }
 0x116   :  { %v187_v1 = vsub.f32 1.0, %v186_v0  ;;  %vm573_vm10 = vmand %vm224_vm6, %vm230_vm5 }
 0x118   :  { %v178_v4 = vpop.f32.mrf.mxu3  ;;  %v188_v6 = vmul.f32 %v395_v63, %v187_v1 }
 0x119   :  { %v179_v5 = vadd.f32 %v178_v4, %v149_v3 }
 0x11a   :  { %v189_v8 = vadd.f32 %v395_v63, %v188_v6 }
 0x11b   :  { %vm183_vm9 = vcmp.le.f32.partialorder %v179_v5, 0.0 }
 0x11c   :  { %v184_v7 = vsel %vm183_vm9, 1.0, %v179_v5  ;;  %v193_v13 = vsel %vm192_vm12, %v395_v63, %v189_v8 }
 0x11d   :  { %396 = vrcp.f32 %v184_v7  ;;  %v212_v18 = vand.u32 2147483648, %v184_v7  ;;  %v198_v19 = vsel %vm195_vm13, %v197_v15, %v193_v13  ;;  %v210_v22 = vand.u32 2147483647, %v184_v7 }
 0x11e   :  { %vm206_vm15 = vweird.f32 %v184_v7  ;;  %v200_v24 = vmul.f32 %v198_v19, %v170_v20 }
 0x11f   :  { %v213_v25 = vor.u32 1.1754944e-38, %v212_v18  ;;  %vm211_vm1 = vcmp.eq.f32.partialorder %v210_v22, 8.507059e+37 }
 0x120   :  { %vm217_vm2 = vcmp.gt.f32.partialorder %v200_v24, 0.0 }
 0x121   :  { %vm331_vm4 = vmneg %vm217_vm2  ;;  %v218_v38 = vsel %vm217_vm2, 1, %v414_v2 }
 0x122   :  { %v276_v37 = vsel %vm331_vm4, 1, %v414_v2 }
 0x123   :  { %v397_v11 = vpop.eup %396 }
 0x124   :  { %v202_v12 = vmul.f32 %v397_v11, %v184_v7  ;;  %vm207_vm14 = vweird.f32 %v397_v11 }
 0x125   :  { %vm208_vm0 = vmor %vm206_vm15, %vm207_vm14 }
 0x126   :  { %v203_v16 = vsub.f32 1.0, %v202_v12 }
 0x128   :  { %v204_v21 = vmul.f32 %v397_v11, %v203_v16 }
 0x12a   :  { %v205_v23 = vadd.f32 %v397_v11, %v204_v21 }
 0x12c   :  { %v209_v27 = vsel %vm208_vm0, %v397_v11, %v205_v23 }
 0x12d   :  { %v214_v28 = vsel %vm211_vm1, %v213_v25, %v209_v27 }
 0x12e   :  { %v216_v29 = vmul.f32 %v214_v28, %v176_v26 }
 0x130   :  { %vm375_vm3 = vcmp.lt.s32.totalorder %v216_v29, 0  ;;  %v376_v30 = vceil.f32 %v216_v29  ;;  %v377_v31 = vfloor.f32 %v216_v29 }
 0x132   :  { %v378_v34 = vsel %vm375_vm3, %v376_v30, %v377_v31 }
 0x133   :  { %v379_v35 = vcvt.f32.s32 %v378_v34 }
 0x135   :  { %vm233_vm7 = vcmp.eq.s32.totalorder %v379_v35, 0  ;;  %v277_v39 = vand.u32 %v379_v35, %v276_v37  ;;  %v234_v40 = vand.u32 %v379_v35, %v218_v38 }
 0x136   :  { %vm248_vm9 = vmand %vm331_vm4, %vm233_vm7 }
 0x137   :  { %v343_v42 = vsel %vm248_vm9, 1.0, %v415_v43  ;;  %v338_v44 = vcvt.s32.f32 %v277_v39  ;;  %v332_v45 = vcvt.s32.f32 %v234_v40  ;;  %vm262_vm11 = vmand %vm217_vm2, %vm233_vm7 }
 0x138   :  { %v335_v36 = vsel %vm573_vm10, %v343_v42, 0.0  ;;  %v344_v50 = vsel %vm262_vm11, 1.0, %v415_v43 }
 0x139   :  { %v252_v2 = vsel %vm237_vm8, %v335_v36, 0.0  ;;  %v339_v46 = vsel %vm573_vm10, %v338_v44, 0.0  ;;  %v333_v47 = vsel %vm573_vm10, %v332_v45, 0.0  ;;  %v337_v51 = vsel %vm573_vm10, %v344_v50, 0.0 }
 0x13a   :  { %253 = vadd.xlane.f32.xlu2 %v252_v2  ;;  %v280_v48 = vsel %vm237_vm8, %v339_v46, 0.0  ;;  %v238_v49 = vsel %vm237_vm8, %v333_v47, 0.0  ;;  %v266_v52 = vsel %vm237_vm8, %v337_v51, 0.0 }
 0x13b   :  { %281 = vadd.xlane.f32.xlu0 %v280_v48  ;;  %239 = vadd.xlane.f32.xlu1 %v238_v49 }
 0x142   :  { %267 = vadd.xlane.f32.xlu2 %v266_v52 }
 0x1ad   :  { %v254_v53 = vpop.xlane.xlu2 %253 }
 0x1ae   :  { %v255_v54 = vrot.slane %v254_v53, 4  ;;  %v282_v55 = vpop.xlane.xlu0 %281  ;;  %v240_v56 = vpop.xlane.xlu1 %239 }
 0x1af   :  { %v283_v57 = vrot.slane %v282_v55, 4  ;;  %v241_v58 = vrot.slane %v240_v56, 4 }
 0x1b0   :  { %v256_v59 = vadd.f32 %v255_v54, %v254_v53 }
 0x1b1   :  { %v284_v60 = vadd.f32 %v283_v57, %v282_v55  ;;  %v242_v61 = vadd.f32 %v241_v58, %v240_v56 }
 0x1b2   :  { %v257_v62 = vrot.slane %v256_v59, 2 }
 0x1b3   :  { %v243_v63 = vrot.slane %v242_v61, 2  ;;  %v285_v1 = vrot.slane %v284_v60, 2 }
 0x1b4   :  { %v258_v0 = vadd.f32 %v257_v62, %v256_v59 }
 0x1b5   :  { %v268_v43 = vpop.xlane.xlu2 %267  ;;  %v244_v3 = vadd.f32 %v243_v63, %v242_v61  ;;  %v286_v9 = vadd.f32 %v285_v1, %v284_v60 }
 0x1b6   :  { %v269_v4 = vrot.slane %v268_v43, 4  ;;  %v259_v5 = vrot.slane %v258_v0, 1 }
 0x1b7   :  { %v245_v6 = vrot.slane %v244_v3, 1  ;;  %v287_v13 = vrot.slane %v286_v9, 1 }
 0x1b8   :  { %v270_v7 = vadd.f32 %v269_v4, %v268_v43  ;;  %v260_v8 = vadd.f32 %v259_v5, %v258_v0 }
 0x1b9   :  { %v246_v10 = vadd.f32 %v245_v6, %v244_v3  ;;  %v288_v16 = vadd.f32 %v287_v13, %v286_v9 }
 0x1ba   :  { %v271_v11 = vrot.slane %v270_v7, 2 }
 0x1bb   :  { %380 = vpush %v246_v10 }
 0x1bc   :  { %v272_v12 = vadd.f32 %v271_v11, %v270_v7  ;;  %382 = vpush %v260_v8 }
 0x1be   :  { %v273_v14 = vrot.slane %v272_v12, 1 }
 0x1c0   :  { %v274_v15 = vadd.f32 %v273_v14, %v272_v12 }
 0x1c2   :  { %384 = vpush %v274_v15 }
 0x1c3   :  { %386 = vpush %v288_v16 }
 0x1ec   :  { %s381_s0 = spop %380 }
 0x1ed   :  { %s383_s1 = spop %382  ;;  %293 = sst [smem:[#allocation3]] %s381_s0 }
 0x1ee   :  { %297 = sst [smem:[#allocation3 + $0x1]] %s383_s1 }
 0x1f3   :  { %s385_s6 = spop %384 }
 0x1f4   :  { %s387_s7 = spop %386  ;;  %301 = sst [smem:[#allocation3 + $0x2]] %s385_s6 }
 0x1f5   :  { %305 = sst [smem:[#allocation3 + $0x3]] %s387_s7 }
 0x1f6   :  { %314 = dma.smem_to_hbm %s417_s8, 16, %s312_s5, [#allocation4]  }
 0x1f7   :  { %412 = dma.done.wait [#allocation4], 16  }
 0x1f8   :  { %413 = vsyncadd [#allocation4], 4294967280 }
 0x1f9   :  { %319 = sfence }
 0x1fa   :  { %320 = vsyncpa [#allocation4], 1 }

</bundles_post_ra>
